<compile_context>
chip_gen: v7x
topology: tpu7x:2x2x1
jax: 0.10.0
libtpu: 0.0.40
codegen_flags: <defaults>
</compile_context>

<pallas_src>
import jax
import jax.numpy as jnp
from jax import lax
from jax.experimental import pallas as pl
from jax.experimental.pallas import tpu as pltpu

EPS = 1e-5  # PyTorch BatchNorm2d default eps


def _make_conv_bn_relu_kernel(KH, H):
    """Fused per-image tile: KH shifted matmuls + folded bias/BN shift + ReLU.

    x_ref:     [1, Hp, Wp*Cin]    one zero-padded image (rows carry the halo)
    w_ref:     [KH, Wp*Cin, wc]   per-kh block-Toeplitz weights, BN scale folded
    shift_ref: [1, wc]            folded conv-bias + BN shift (f32)
    o_ref:     [1, H, wc]         lane-dense output slab
    """
    def kernel(x_ref, w_ref, shift_ref, o_ref):
        x = x_ref[0]                                             # [Hp, Wp*Cin]
        acc = jnp.dot(x[0:H, :], w_ref[0],
                      preferred_element_type=jnp.float32)
        for kh in range(1, KH):                                  # static unroll
            acc = acc + jnp.dot(x[kh:kh + H, :], w_ref[kh],
                                preferred_element_type=jnp.float32)
        o_ref[0] = jnp.maximum(acc + shift_ref[...], 0.0).astype(o_ref.dtype)
    return kernel


def _vmem_limit_bytes():
    """Per-generation scoped-VMEM limit: ~3/4 of physical VMEM.

    ~96 MiB on v5e/v6e (128 MiB physical), ~48 MiB on v7x (64 MiB physical).
    """
    try:
        cap = pltpu.get_tpu_info().vmem_capacity_bytes
        return int(min(cap * 3 // 4, 96 * 1024 * 1024))
    except Exception:
        return 48 * 1024 * 1024  # v7x-safe fallback


class PallasFunctionalConvBNReLU:
    """JAX/Pallas analogue of functorch's FunctionalModule for the concrete
    stateless model Conv2d(Cin,Cout,3,padding=1) -> BatchNorm2d(eval) -> ReLU.

    Only *parameters* are passed to forward(); the non-parameter state of the
    (deep-copied) stateless model -- BN running statistics -- lives on the
    wrapper, mirroring FunctionalModule semantics.
    """

    def __init__(self, bn_running_mean, bn_running_var, eps=EPS):
        self.bn_mean = bn_running_mean
        self.bn_var = bn_running_var
        self.eps = eps

    def forward(self, params, x_nchw, *, compute_dtype=jnp.bfloat16,
                out_dtype=jnp.float32, channels_last_output=False):
        conv_w, conv_b, bn_gamma, bn_beta = params
        N, Cin, H, W = x_nchw.shape
        Cout, Cin_w, KH, KW = conv_w.shape
        assert Cin == Cin_w and KH % 2 == 1 and KW % 2 == 1
        ph, pw = KH // 2, KW // 2                  # 'SAME' padding
        Hp, Wp = H + 2 * ph, W + 2 * pw
        WpCin = Wp * Cin                           # per-matmul contraction dim
        WC = W * Cout                              # lane-dense output width

        # ------------- host-side layout prep (no im2row replication) --------
        x_nhwc = jnp.transpose(x_nchw, (0, 2, 3, 1)).astype(jnp.float32)
        x_pad = jnp.pad(x_nhwc, ((0, 0), (ph, ph), (pw, pw), (0, 0)))
        x_rows = x_pad.reshape(N, Hp, WpCin).astype(compute_dtype)

        # Fold eval-mode BN scale into the per-kh block-Toeplitz weights (f32,
        # then cast).  wk[kh, wp*Cin+ci, w*Cout+c] = W[c,ci,kh,wp-w] * scale[c].
        scale_c = bn_gamma.astype(jnp.float32) * lax.rsqrt(
            self.bn_var.astype(jnp.float32) + self.eps)
        shift_c = (bn_beta.astype(jnp.float32)
                   + (conv_b - self.bn_mean).astype(jnp.float32) * scale_c)
        w_hwio = jnp.transpose(conv_w, (2, 3, 1, 0)).astype(jnp.float32)
        w_hwio = w_hwio * scale_c[None, None, None, :]
        wk = jnp.zeros((KH, Wp, Cin, W, Cout), jnp.float32)
        for w in range(W):                         # static trace-time loop
            wk = wk.at[:, w:w + KW, :, w, :].set(w_hwio)
        wk = wk.reshape(KH, WpCin, WC).astype(compute_dtype)
        shift = jnp.tile(shift_c, W).reshape(1, WC)            # f32 epilogue

        # ------------- output-width tiling (v7x VMEM guard) -----------------
        if WC <= 512:
            wc_tile = WC
        else:
            wc_tile = WC
            for cand in (512, 384, 256, 128):
                if WC % cand == 0:
                    wc_tile = cand
                    break
        num_wc = WC // wc_tile
        # TODO(synk): for very large W also tile the contraction (input-width)
        # dim with a KW-1 halo; the per-kh Toeplitz weight still grows as W^2.

        vmem_limit = _vmem_limit_bytes()
        cb = jnp.dtype(compute_dtype).itemsize
        ob = jnp.dtype(out_dtype).itemsize
        est = 2 * (Hp * WpCin * cb + KH * WpCin * wc_tile * cb
                   + wc_tile * 4 + H * wc_tile * ob)
        assert est < vmem_limit, (
            f"per-step VMEM estimate {est} B exceeds limit {vmem_limit} B; "
            "tile the output width / image height further")

        kernel = _make_conv_bn_relu_kernel(KH, H)
        out = pl.pallas_call(
            kernel,
            out_shape=jax.ShapeDtypeStruct((N, H, WC), out_dtype),
            grid_spec=pltpu.PrefetchScalarGridSpec(
                num_scalar_prefetch=0,
                grid=(N, num_wc),
                in_specs=[
                    pl.BlockSpec((1, Hp, WpCin), lambda n, j: (n, 0, 0)),
                    pl.BlockSpec((KH, WpCin, wc_tile), lambda n, j: (0, 0, j)),
                    pl.BlockSpec((1, wc_tile), lambda n, j: (0, j)),
                ],
                out_specs=pl.BlockSpec((1, H, wc_tile), lambda n, j: (n, 0, j)),
            ),
            compiler_params=pltpu.CompilerParams(
                dimension_semantics=("parallel", "parallel"),
                vmem_limit_bytes=vmem_limit,
            ),
        )(x_rows, wk, shift)

        out_nhwc = out.reshape(N, H, W, Cout)
        if channels_last_output:
            return out_nhwc                        # skip the transpose pass
        return jnp.transpose(out_nhwc, (0, 3, 1, 2))  # back to NCHW

    __call__ = forward


def reference_forward(params, buffers, x_nchw):
    conv_w, conv_b, bn_gamma, bn_beta = params
    bn_mean, bn_var = buffers
    y = lax.conv_general_dilated(
        x_nchw, conv_w, window_strides=(1, 1), padding="SAME",
        dimension_numbers=("NCHW", "OIHW", "NCHW"))
    y = y + conv_b[None, :, None, None]
    scale = bn_gamma / jnp.sqrt(bn_var + EPS)
    shift = bn_beta - bn_mean * scale
    y = y * scale[None, :, None, None] + shift[None, :, None, None]
    return jnp.maximum(y, 0.0)


if __name__ == "__main__":
    key = jax.random.PRNGKey(0)
    k_x, k_w, k_b, k_g, k_be, k_m, k_v = jax.random.split(key, 7)

    N, Cin, H, W = 2, 4, 16, 16
    Cout, KH, KW = 8, 3, 3

    x = jax.random.normal(k_x, (N, Cin, H, W), jnp.float32)

    # Parameters, in the order extract_weights() would yield them.
    conv_w = 0.1 * jax.random.normal(k_w, (Cout, Cin, KH, KW), jnp.float32)
    conv_b = 0.1 * jax.random.normal(k_b, (Cout,), jnp.float32)
    bn_gamma = 1.0 + 0.1 * jax.random.normal(k_g, (Cout,), jnp.float32)
    bn_beta = 0.1 * jax.random.normal(k_be, (Cout,), jnp.float32)
    params = (conv_w, conv_b, bn_gamma, bn_beta)

    # Buffers: state of the (copied) stateless model, NOT forward arguments.
    bn_mean = 0.1 * jax.random.normal(k_m, (Cout,), jnp.float32)
    bn_var = jax.random.uniform(k_v, (Cout,), jnp.float32, 0.5, 1.5)

    fmod = PallasFunctionalConvBNReLU(bn_mean, bn_var)
    ref = reference_forward(params, (bn_mean, bn_var), x)

    # Default path: bf16 MXU streaming (all generations incl. v5e),
    # f32 accumulation + f32 epilogue, f32 NCHW output.
    out_bf16 = jax.block_until_ready(fmod(params, x))
    assert out_bf16.shape == (N, Cout, H, W)
    assert jnp.allclose(out_bf16, ref, atol=5e-2, rtol=5e-2), \
        "bf16 mismatch vs reference"

    # f32 streaming path: tight numerics check of the shifted-matmul lowering.
    out_f32 = jax.block_until_ready(fmod(params, x, compute_dtype=jnp.float32))
    assert jnp.allclose(out_f32, ref, atol=2e-4, rtol=2e-4), \
        "f32 mismatch vs reference"

    # Channels-last + bf16 writeback: skips the post-kernel transpose pass and
    # halves output HBM traffic for channels-last consumers.
    out_nhwc = jax.block_until_ready(
        fmod(params, x, out_dtype=jnp.bfloat16, channels_last_output=True))
    assert out_nhwc.shape == (N, H, W, Cout)
    assert jnp.allclose(
        jnp.transpose(out_nhwc.astype(jnp.float32), (0, 3, 1, 2)), ref,
        atol=5e-2, rtol=5e-2), "NHWC/bf16 mismatch vs reference"

    print("KERNEL_OK")
</pallas_src>

<mosaic_0001>
module attributes {stable_mosaic.version = 11 : i64} {
  func.func @kernel(%arg0: i32, %arg1: i32, %arg2: memref<1x18x72xbf16, #tpu.memory_space<vmem>>, %arg3: memref<3x72x128xbf16, #tpu.memory_space<vmem>>, %arg4: memref<1x128xf32, #tpu.memory_space<vmem>>, %arg5: memref<1x16x128xf32, #tpu.memory_space<vmem>>) attributes {dimension_semantics = [#tpu.dimension_semantics<parallel>, #tpu.dimension_semantics<parallel>], iteration_bounds = array<i64: 2, 1>, scalar_prefetch = 0 : i64, scratch_operands = 0 : i64, tpu.core_type = #tpu.core_type<tc>, window_params = [{transform_indices = @transform_0, window_bounds = array<i64: 1, 18, 72>}, {transform_indices = @transform_1, window_bounds = array<i64: 3, 72, 128>}, {transform_indices = @transform_2, window_bounds = array<i64: 1, 128>}, {transform_indices = @transform_3, window_bounds = array<i64: 1, 16, 128>}]} {
    %c0 = arith.constant 0 : index
    %c0_0 = arith.constant 0 : index
    %c0_1 = arith.constant 0 : index
    %0 = vector.load %arg2[%c0, %c0_0, %c0_1] : memref<1x18x72xbf16, #tpu.memory_space<vmem>>, vector<1x18x72xbf16>
    %1 = vector.shape_cast %0 : vector<1x18x72xbf16> to vector<18x72xbf16>
    %2 = vector.extract_strided_slice %1 {offsets = [0, 0], sizes = [16, 72], strides = [1, 1]} : vector<18x72xbf16> to vector<16x72xbf16>
    %c0_2 = arith.constant 0 : index
    %c0_3 = arith.constant 0 : index
    %c0_4 = arith.constant 0 : index
    %3 = vector.load %arg3[%c0_2, %c0_3, %c0_4] : memref<3x72x128xbf16, #tpu.memory_space<vmem>>, vector<1x72x128xbf16>
    %4 = vector.shape_cast %3 : vector<1x72x128xbf16> to vector<72x128xbf16>
    %cst = arith.constant dense<0.000000e+00> : vector<16x128xf32>
    %5 = tpu.matmul %2, %4, %cst {dimension_numbers = #tpu.dot_dimension_numbers<[1], [0], [0], [1], [0, 0, 1, 1], [], []>} : vector<16x72xbf16>, vector<72x128xbf16>, vector<16x128xf32> -> vector<16x128xf32>
    %6 = vector.extract_strided_slice %1 {offsets = [1, 0], sizes = [16, 72], strides = [1, 1]} : vector<18x72xbf16> to vector<16x72xbf16>
    %c1 = arith.constant 1 : index
    %c0_5 = arith.constant 0 : index
    %c0_6 = arith.constant 0 : index
    %7 = vector.load %arg3[%c1, %c0_5, %c0_6] : memref<3x72x128xbf16, #tpu.memory_space<vmem>>, vector<1x72x128xbf16>
    %8 = vector.shape_cast %7 : vector<1x72x128xbf16> to vector<72x128xbf16>
    %cst_7 = arith.constant dense<0.000000e+00> : vector<16x128xf32>
    %9 = tpu.matmul %6, %8, %cst_7 {dimension_numbers = #tpu.dot_dimension_numbers<[1], [0], [0], [1], [0, 0, 1, 1], [], []>} : vector<16x72xbf16>, vector<72x128xbf16>, vector<16x128xf32> -> vector<16x128xf32>
    %10 = arith.addf %5, %9 : vector<16x128xf32>
    %11 = vector.extract_strided_slice %1 {offsets = [2, 0], sizes = [16, 72], strides = [1, 1]} : vector<18x72xbf16> to vector<16x72xbf16>
    %c2 = arith.constant 2 : index
    %c0_8 = arith.constant 0 : index
    %c0_9 = arith.constant 0 : index
    %12 = vector.load %arg3[%c2, %c0_8, %c0_9] : memref<3x72x128xbf16, #tpu.memory_space<vmem>>, vector<1x72x128xbf16>
    %13 = vector.shape_cast %12 : vector<1x72x128xbf16> to vector<72x128xbf16>
    %cst_10 = arith.constant dense<0.000000e+00> : vector<16x128xf32>
    %14 = tpu.matmul %11, %13, %cst_10 {dimension_numbers = #tpu.dot_dimension_numbers<[1], [0], [0], [1], [0, 0, 1, 1], [], []>} : vector<16x72xbf16>, vector<72x128xbf16>, vector<16x128xf32> -> vector<16x128xf32>
    %15 = arith.addf %10, %14 : vector<16x128xf32>
    %c0_11 = arith.constant 0 : index
    %c0_12 = arith.constant 0 : index
    %16 = vector.load %arg4[%c0_11, %c0_12] : memref<1x128xf32, #tpu.memory_space<vmem>>, vector<1x128xf32>
    %17 = vector.broadcast %16 : vector<1x128xf32> to vector<16x128xf32>
    %18 = arith.addf %15, %17 : vector<16x128xf32>
    %cst_13 = arith.constant 0.000000e+00 : f32
    %19 = vector.broadcast %cst_13 : f32 to vector<16x128xf32>
    %20 = arith.maximumf %18, %19 : vector<16x128xf32>
    %c0_14 = arith.constant 0 : index
    %c0_15 = arith.constant 0 : index
    %c0_16 = arith.constant 0 : index
    %21 = vector.load %arg5[%c0_14, %c0_15, %c0_16] : memref<1x16x128xf32, #tpu.memory_space<vmem>>, vector<1x16x128xf32>
    %22 = vector.shape_cast %21 : vector<1x16x128xf32> to vector<16x128xf32>
    %23 = vector.shape_cast %20 : vector<16x128xf32> to vector<1x16x128xf32>
    tpu.vector_store %arg5[%c0_14, %c0_15, %c0_16], %23 {strides = array<i32>} : memref<1x16x128xf32, #tpu.memory_space<vmem>>, vector<1x16x128xf32>,
    return
  }
  func.func @transform_0(%arg0: i32, %arg1: i32) -> (i32, i32, i32) {
    %c0_i32 = arith.constant 0 : i32
    %c0_i32_0 = arith.constant 0 : i32
    %c0_i32_1 = arith.constant 0 : i32
    return %arg0, %c0_i32, %c0_i32_0 : i32, i32, i32
  }
  func.func @transform_1(%arg0: i32, %arg1: i32) -> (i32, i32, i32) {
    %c0_i32 = arith.constant 0 : i32
    %c0_i32_0 = arith.constant 0 : i32
    %c0_i32_1 = arith.constant 0 : i32
    return %c0_i32, %c0_i32_0, %arg1 : i32, i32, i32
  }
  func.func @transform_2(%arg0: i32, %arg1: i32) -> (i32, i32) {
    %c0_i32 = arith.constant 0 : i32
    %c0_i32_0 = arith.constant 0 : i32
    return %c0_i32, %arg1 : i32, i32
  }
  func.func @transform_3(%arg0: i32, %arg1: i32) -> (i32, i32, i32) {
    %c0_i32 = arith.constant 0 : i32
    %c0_i32_0 = arith.constant 0 : i32
    return %arg0, %c0_i32, %arg1 : i32, i32, i32
  }
}

</mosaic_0001>

<bundles_post_ra>
// kernel: tpu_custom_call.1
= control target key start
LH: loop header
LB: loop body
LE: loop exit
PB: predicated region body
PF: predicated region fallthrough
CT: control target
= control target key end

     0   :  { %8 = vsyncpa [#allocation3], 0  ;;  %s1139_s0 = inlined_call_operand.vmem [shape: bf16[2,18,72], index: 0, kind: input, shape index: {}]   ;;  %s1140_s1 = inlined_call_operand.hbm [shape: bf16[3,72,128], index: 1, kind: input, shape index: {}]   ;;  %s1141_s2 = inlined_call_operand.vmem [shape: f32[1,128], index: 2, kind: input, shape index: {}]   ;;  %s1142_s3 = inlined_call_operand.hbm [shape: f32[2,16,128], index: 3, kind: output, shape index: {}]  }
   0x1   :  { %9 = vsyncpa [#allocation4], 0 }
   0x2   :  { %11 = vsyncpa [#allocation4 + $0x1], 0  ;;  %s955_s12 = smov 0   ;;  %s957_s13 = smov 0  }
   0x3   :  { %s959_s14 = smov 0   ;;  %s961_s15 = smov 0  }
   0x4   :  { %s963_s16 = smov 0   ;;  %s965_s17 = smov 0  }
   0x5 LB: > { %s628_s18 = sadd.s32 4294967295, %s925_s17   ;;  %s629_s19 = sadd.s32 4294967294, %s925_s17   ;;  %s925_s17 = sphi %s965_s17, %s17_s17   ;;  %s921_s16 = sphi %s963_s16, %s1160_s16   ;;  %s917_s15 = sphi %s961_s15, %s1159_s15   ;;  %s913_s14 = sphi %s959_s14, %s1158_s14   ;;  %s909_s13 = sphi %s957_s13, %s1157_s13   ;;  %s905_s12 = sphi %s955_s12, %s1156_s12  }
   0x6   : > { %s29_s20 = sadd.s32 1, %s921_s16  ;;  %s116_s21 = sadd.s32 1, %s913_s14 }
   0x7   : > { %p31_p0 = scmp.ge.s32.totalorder %s29_s20, 2  ;;  %p126_p1 = scmp.ne.s32.totalorder %s913_s14, %s909_s13 }
   0x8   : > { %p127_p2 = scmp.eq.s32.totalorder %s628_s18, 1  ;;  %p132_p3 = scmp.ne.s32.totalorder %s909_s13, %s905_s12 }
   0x9   : > { %s1162_s20 = smov (%p31_p0, %s29_s20), 0  ;;  %p133_p5 = scmp.eq.s32.totalorder %s629_s19, 1 }
   0xa   : > { %p995_p4 = por %p127_p2, %p126_p1  ;;  %s111_s23 = ssub.s32 %s921_s16, %s1162_s20 }
   0xb   : > { %p630_p6 = scmp.ge.s32.totalorder %s925_s17, 1  ;;  %p114_p7 = scmp.eq.s32.totalorder %s111_s23, 0 }
   0xc   : > { %s1147_s22 = scalar_select %p995_p4, 1, 0 }
   0xd   : > { %p1002_p8 = por %p133_p5, %p132_p3  ;;  %p140_p9 = scmp.lt.s32.totalorder %s925_s17, 3 }
   0xe   : > { %s1008_s25 = scalar_select %p114_p7, %s913_s14, %s116_s21  }
   0xf   : > { %s1148_s24 = scalar_select %p1002_p8, 1, 0 }
  0x10   : > { %p1010_p10 = pnand %p630_p6, %p140_p9  ;;  %p1014_p11 = scmp.eq.s32.totalorder %s628_s18, 0 }
  0x11   : > { %s927_s28 = smov [#allocation2]   ;;  %s815_s6 = scalar_lea.hbm %s1140_s1, 1728 }
  0x12   : > { %s1149_s26 = scalar_select %p1010_p10, 1, 0 }
  0x13   : > { %s1150_s27 = scalar_select %p1014_p11, 1, 0 }
  0x14   : > { %p732_p12 = pneg %p1010_p10  ;;  %s154_s29 = sshll.u32 %s927_s28, 4  ;;  %s155_s29 = int_to_ptr.vmem [resolvable:$true] %s154_s29 }
  0x15   : > { %p816_p0 = scmp.ne.s32.totalorder %s1140_s1, %s815_s6  ;;  %p822_p5 = scmp.lt.u32.totalorder %s815_s6, %s1140_s1 }
  0x16   : > { %p1022_p13 = pnand %p1014_p11, %p732_p12 }
  0x18   : > { %p817_p1 = pneg %p1022_p13 }
  0x1a   : > { %p818_p2 = pnand %p817_p1, %p816_p0 }
  0x1c   : > { %p819_p3 = pneg %p818_p2 }
  0x1e   : > { %p824_p6 = pnand %p822_p5, %p819_p3 }
  0x20   : > { %827 = shalt.err (!%p824_p6)
}
  0x21   : > { %s828_s11 = scalar_lea.vmem %s155_s29, 1728  ;;  %p836_p8 = scmp.lt.s32.totalorder %s155_s29, %s155_s29 }
  0x22   : > { %p829_p7 = scmp.ne.s32.totalorder %s155_s29, %s828_s11  ;;  %p837_p4 = scmp.lt.s32.totalorder %s828_s11, %s828_s11 }
  0x24   : > { %p831_p9 = pnand %p829_p7, %p817_p1  ;;  %p838_p11 = por %p837_p4, %p836_p8 }
  0x26   : > { %p832_p12 = pneg %p831_p9 }
  0x28   : > { %p839_p10 = pnand %p838_p11, %p832_p12 }
  0x2a   : > { %842 = shalt.err (!%p839_p10)
}
  0x2b   : > { %s928_s18 = smov 64   ;;  %s929_s19 = smov 4  }
  0x2c   : > { %735 = dma.hbm_to_vmem [thread:$0]  (!%p1022_p13), %s1140_s1, 1728, %s155_s29, [#allocation3], %s928_s18, %s928_s18, %s929_s19  }
  0x2d   : > { %p1152_p0 = scmp.ne.s32.totalorder %s1149_s26, 0 }
  0x2e   : > { %p1153_p2 = scmp.ne.s32.totalorder (!%p1152_p0), %s1150_s27, 0 }
  0x2f   : > { %184 = sbr.rel (%p1152_p0) target bundleno = 332 (0x14c), region = 32 }
  0x36   : > { %896 = dma.done.wait (%p1153_p2), [#allocation3], 1728  }
  0x37   : > { %898 = vsyncadd (%p1153_p2), [#allocation3], 4294965568  ;;  %v930_v0 = vmov 0.0   ;;  %vm931_vm0 = vmmov 0   ;;  %p211_p4 = scmp.lt.s32.totalorder %s917_s15, 1  ;;  %v798_v1 = vld [vmem:[#allocation2 + $0x24] sm:$0xff]  }
  0x38   : > { %683 = vmatprep.subr.bf16.mxu0 %v930_v0  ;;  %697 = vmatprep.subr.bf16.mxu1 %v930_v0  ;;  %v799_v2 = vld [vmem:[#allocation2] sm:$0xff]   ;;  %v800_v3 = vld [vmem:[#allocation2 + $0x2c] sm:$0xff]   ;;  %v802_v5 = vld [vmem:[#allocation2 + $0x34] sm:$0xff]   ;;  %vm250_vm1 = vsmask.f32 7424  ;;  %vm294_vm2 = vcmask 1043456  }
  0x39   : > { %693 = vmatprep.mubr.msk.bf16.mxu0 %vm931_vm0, %v930_v0  ;;  %707 = vmatprep.mubr.msk.bf16.mxu1 %vm931_vm0, %v930_v0  ;;  %s212_s26 = scalar_select %p211_p4, %s917_s15, 1  ;;  %v801_v4 = vld [vmem:[#allocation2 + $0x8] sm:$0xff]   ;;  %v803_v6 = vld [vmem:[#allocation2 + $0x10] sm:$0xff]   ;;  %v804_v7 = vld [vmem:[#allocation2 + $0x3c] sm:$0xff]   ;;  %vm290_vm3 = vcmask 588800   ;;  %vm422_vm4 = vcmask 1046528  }
  0x3a   : > { %684 = vmatpush3.bf16.msra.mxu0 %v798_v1  ;;  %698 = vmatpush3.bf16.msra.mxu1 %v799_v2  ;;  %v806_v8 = vld [vmem:[#allocation2 + $0x44] ss:$0 sps:$4 sm:$0xff]   ;;  %v805_v10 = vld [vmem:[#allocation2 + $0x18] sm:$0xff]   ;;  %v807_v12 = vld [vmem:[#allocation2 + $0x20] ss:$0 sps:$4 sm:$0xff]   ;;  %s208_s4 = sand.u32 1, %s909_s13  }
  0x3b   : > { %685 = vmatprep.subr.bf16.mxu0 %v930_v0  ;;  %s725_s27 = smul.u32 12, %s212_s26  ;;  %699 = vmatprep.subr.bf16.mxu1 %v930_v0  ;;  %v296_v17 = vsel %vm294_vm2, %v806_v8, 0  ;;  %v369_v19 = vsel %vm294_vm2, %v807_v12, 0  ;;  %v810_v22 = vld [vmem:[#allocation2 + $0x48] sm:$0xff]   ;;  %v811_v23 = vld [vmem:[#allocation2 + $0x50] sm:$0xff]   ;;  %v812_v24 = vld [vmem:[#allocation2 + $0x58] sm:$0xff]  }
  0x3c   : > { %v813_v25 = vld [vmem:[#allocation2 + $0x60] sm:$0xff]   ;;  %v814_v26 = vld [vmem:[#allocation2 + $0x68] ss:$0 sps:$4 sm:$0xff]   ;;  %s636_s5 = sshll.u32 %s208_s4, 4  ;;  %s664_s10 = sshll.u32 %s917_s15, 8 }
  0x3d   : > { %s215_s30 = scalar_lea.vmem %s1139_s0, %s725_s27  ;;  %v457_v29 = vsel %vm294_vm2, %v814_v26, 0  ;;  %v658_v42 = vld [vmem:[%s1141_s2] ss:$0 sm:$0xff]  ;;  %s210_s8 = scalar_lea.vmem [#allocation5], %s636_s5 }
  0x3e   : > { %686 = vmatpush3.bf16.msra.mxu0 %v800_v3  ;;  %700 = vmatpush3.bf16.msra.mxu1 %v801_v4  ;;  %v808_v9 = vld [vmem:[%s215_s30] sm:$0xff]   ;;  %v809_v11 = vld [vmem:[%s215_s30 + $0x8] ss:$0 sps:$4 sm:$0x11]   ;;  %s530_s9 = sshll.u32 %s210_s8, 4  ;;  %s1091_s19 = scalar_lea.hbm %s1142_s3, %s664_s10  ;;  %s1086_s9 = int_to_ptr.vmem [resolvable:$true] %s530_s9 }
  0x3f   : > { %687 = vmatprep.subr.bf16.mxu0 %v930_v0  ;;  %701 = vmatprep.subr.bf16.mxu1 %v930_v0  ;;  %v252_v13 = vshrl.u32 %v808_v9, 16  ;;  %v254_v14 = vshll.u32 %v808_v9, 16  ;;  %v259_v15 = vshll.u32 %v809_v11, 16  ;;  %v423_v27 = vrot.slane %v808_v9, 1  ;;  %s1093_s21 = scalar_lea.sflag [#allocation4], %s208_s4  ;;  %s843_s23 = scalar_lea.vmem %s1086_s9, 256 }
  0x40   : > { %v424_v28 = vrot.slane %v809_v11, 1  ;;  %p844_p8 = scmp.ne.s32.totalorder %s1086_s9, %s843_s23  ;;  %p1154_p10 = scmp.ne.s32.totalorder %s1147_s22, 0 }
  0x41   : > { %v256_v16 = vrot.slane %v254_v14, 1  ;;  %v261_v18 = vrot.slane %v259_v15, 1  ;;  %s932_s15 = smov [#allocation5]  }
  0x42   : > { %688 = vmatpush3.bf16.msra.mxu0 %v802_v5  ;;  %702 = vmatpush3.bf16.msra.mxu1 %v803_v6  ;;  %v425_v30 = vsel %vm422_vm4, %v423_v27, %v424_v28  ;;  %p845_p11 = pnand %p844_p8, %p1154_p10  ;;  %s847_s26 = sshll.u32 %s932_s15, 4  ;;  %s848_s26 = int_to_ptr.vmem [resolvable:$false] %s847_s26 }
  0x43   : > { %689 = vmatprep.subr.bf16.mxu0 %v930_v0  ;;  %703 = vmatprep.subr.bf16.mxu1 %v930_v0  ;;  %v257_v20 = vor.u32 %v256_v16, %v252_v13  ;;  %s849_s27 = scalar_lea.vmem %s848_s26, 512  ;;  %p850_p1 = scmp.lt.s32.totalorder %s1086_s9, %s848_s26 }
  0x44   : > { %p846_p13 = pneg %p845_p11  ;;  %p851_p3 = scmp.lt.s32.totalorder %s849_s27, %s843_s23 }
  0x45   : > { %v262_v21 = vsel %vm250_vm1, %v257_v20, %v261_v18 }
  0x46   : > { %690 = vmatpush3.bf16.msra.mxu0 %v804_v7  ;;  %704 = vmatpush3.bf16.msra.mxu1 %v805_v10  ;;  %p852_p5 = por %p851_p3, %p850_p1 }
  0x47   : > { %691 = vmatprep.subr.bf16.mxu0 %v930_v0  ;;  %705 = vmatprep.subr.bf16.mxu1 %v930_v0 }
  0x48   : > { %p853_p6 = pnand %p852_p5, %p846_p13 }
  0x4a   : > { %692 = vmatpush3.bf16.msra.mxu0 %v296_v17  ;;  %706 = vmatpush3.bf16.msra.mxu1 %v369_v19 }
  0x4b   : > { %711 = vmatprep.subr.bf16.mxu0 %v930_v0 }
  0x4d   : > { %694 = vmatmul.mubr.msk.bf16.vlgmr.msra.gmra.mrb[0].mxu0 %vm290_vm3, %v262_v21  ;;  %708 = vmatmul.mubr.msk.bf16.vlgmr.msra.gmra.mrb[0].mxu1 %vm290_vm3, %v808_v9 }
  0x4e   : > { %712 = vmatpush3.bf16.msra.mxu0 %v810_v22  ;;  %721 = vmatprep.mubr.msk.bf16.mxu0 %vm931_vm0, %v930_v0 }
  0x4f   : > { %713 = vmatprep.subr.bf16.mxu0 %v930_v0 }
  0x52   : > { %714 = vmatpush3.bf16.msra.mxu0 %v811_v23 }
  0x53   : > { %715 = vmatprep.subr.bf16.mxu0 %v930_v0 }
  0x56   : > { %716 = vmatpush3.bf16.msra.mxu0 %v812_v24 }
  0x57   : > { %717 = vmatprep.subr.bf16.mxu0 %v930_v0 }
  0x5a   : > { %718 = vmatpush3.bf16.msra.mxu0 %v813_v25 }
  0x5b   : > { %719 = vmatprep.subr.bf16.mxu0 %v930_v0 }
  0x5e   : > { %720 = vmatpush3.bf16.msra.mxu0 %v457_v29 }
  0x61   : > { %722 = vmatmul.mubr.msk.bf16.vlgmr.msra.gmra.mrb[4].mxu0 %vm290_vm3, %v425_v30 }
 0x120   : > { %v332_v31 = vpop.f32.mrb[0].mxu0  ;;  %v405_v32 = vpop.f32.mrb[0].mxu1 }
 0x121   : > { %v695_v33 = vpop.f32.mrb[1].mxu0  ;;  %v406_v34 = vadd.f32 %v405_v32, %v332_v31  ;;  %v709_v35 = vpop.f32.mrb[1].mxu1 }
 0x122   : > { %v335_v36 = vpop.f32.mrb[2].mxu0  ;;  %v408_v37 = vpop.f32.mrb[2].mxu1 }
 0x123   : > { %v696_v38 = vpop.f32.mrb[3].mxu0  ;;  %v409_v39 = vadd.f32 %v408_v37, %v335_v36  ;;  %v710_v40 = vpop.f32.mrb[3].mxu1 }
 0x134   : > { %v493_v41 = vpop.f32.mrb[4].mxu0 }
 0x135   : > { %v500_v43 = vadd.f32 %v493_v41, %v406_v34  ;;  %v723_v44 = vpop.f32.mrb[5].mxu0 }
 0x136   : > { %v496_v45 = vpop.f32.mrb[6].mxu0 }
 0x137   : > { %v509_v46 = vadd.f32 %v658_v42, %v500_v43  ;;  %v501_v47 = vadd.f32 %v496_v45, %v409_v39  ;;  %v724_v48 = vpop.f32.mrb[7].mxu0 }
 0x139   : > { %v511_v49 = vmax.f32 %v509_v46, 0.0  ;;  %v510_v50 = vadd.f32 %v658_v42, %v501_v47 }
 0x13b   : > { %513 = vst [vmem:[%s210_s8] sm:$0xff] %v511_v49  ;;  %v512_v51 = vmax.f32 %v510_v50, 0.0 }
 0x13d   : > { %514 = vst [vmem:[%s210_s8 + $0x8] sm:$0xff] %v512_v51 }
 0x13e   : > { %856 = shalt.err (!%p853_p6)
}
 0x13f   : > { %s857_s28 = scalar_lea.hbm %s1091_s19, 256  ;;  %s861_s4 = scalar_lea.hbm %s1142_s3, 512 }
 0x140   : > { %p858_p7 = scmp.ne.s32.totalorder %s1091_s19, %s857_s28  ;;  %p862_p0 = scmp.lt.u32.totalorder %s1091_s19, %s1142_s3 }
 0x141   : > { %p863_p2 = scmp.lt.u32.totalorder %s861_s4, %s857_s28  ;;  %p865_p8 = scmp.lt.u32.totalorder %s857_s28, %s1091_s19 }
 0x142   : > { %p859_p9 = pnand %p858_p7, %p1154_p10 }
 0x143   : > { %p864_p4 = por %p863_p2, %p862_p0 }
 0x144   : > { %p860_p12 = pneg %p859_p9 }
 0x145   : > { %p866_p11 = por %p865_p8, %p864_p4 }
 0x147   : > { %p867_p13 = pnand %p866_p11, %p860_p12 }
 0x149   : > { %870 = shalt.err (!%p867_p13)
}
 0x14a   : > { %s933_s7 = smov 128   ;;  %s934_s8 = smov 8  }
 0x14b   : > { %730 = dma.vmem_to_hbm [thread:$0]  (%p1154_p10), %s1086_s9, 256, %s1091_s19, %s1093_s21, %s933_s7, %s933_s7, %s934_s8  }
 0x14c PF: > { %p742_p1 = scmp.ge.s32.totalorder %s925_s17, 2  ;;  %s545_s10 = sand.u32 1, %s905_s12  }
 0x14d   : > { %p1155_p3 = scmp.ne.s32.totalorder %s1148_s24, 0  ;;  %s546_s11 = scalar_lea.sflag [#allocation4], %s545_s10 }
 0x14f   : > { %p737_p5 = pnand %p742_p1, %p1155_p3 }
 0x151   : > { %900 = dma.done.wait (!%p737_p5), %s546_s11, 256  }
 0x152   : > { %902 = vsyncadd (!%p737_p5), %s546_s11, 4294967040  ;;  %s17_s17 = sadd.s32 1, %s925_s17   ;;  %s1156_s12 = smov %s909_s13 }
 0x153   : > { %p14_p6 = scmp.ge.s32.totalorder %s17_s17, 4   ;;  %s1157_s13 = smov %s913_s14 }
 0x154   : > { %s1158_s14 = smov %s1008_s25  ;;  %s1159_s15 = smov %s921_s16 }
 0x155   : > { %s1160_s16 = smov %s1162_s20  ;;  %16 = sbr.rel (!%p14_p6) target bundleno = 5 (0x5), region = 78 }
 0x15c   :  { %551 = vsyncpa [#allocation3], 1 }
 0x15d   :  { %553 = vsyncpa [#allocation3 + $0x1], 1 }
 0x15e   :  { %554 = vsyncpa [#allocation4], 1 }
 0x15f   :  { %556 = vsyncpa [#allocation4 + $0x1], 1 }

</bundles_post_ra>
